<compile_context>
chip_gen: v7x
topology: tpu7x:2x2x1
jax: 0.10.0
libtpu: 0.0.40
codegen_flags: <defaults>
</compile_context>

<pallas_src>
import math
from functools import lru_cache

import numpy as np
import jax
import jax.numpy as jnp
from jax import lax
from jax.experimental import pallas as pl
from jax.experimental.pallas import tpu as pltpu

NHEAD = 12
NUM_MODULES = 15            # args is None -> not v5 -> 15 modules per event
ENC_DIMS = [96, 192, 384, 768]
ENC_DEPTHS = [3, 3, 9, 3]
DEC_DIMS = [768, 384, 192, 96]
DEC_DEPTHS = [2, 2, 2]

LEVEL_PAD = 256                      # voxel rows padded to a multiple of this
VMEM_LIMIT = 48 * 1024 * 1024        # raised scoped-VMEM limit (fits v7x 64MiB)


def _round_up(n, m):
    return ((n + m - 1) // m) * m


def _row_tiling(n, tm=256):
    """(padded rows, row tile) for a gridded row-wise kernel."""
    if n >= tm:
        return _round_up(n, tm), tm
    npad = _round_up(max(n, 1), 64)   # bucket small calls -> fewer compiles
    return npad, npad


def _cparams(rank=1):
    return pltpu.CompilerParams(
        dimension_semantics=("parallel",) * rank,
        vmem_limit_bytes=VMEM_LIMIT)


def _block_tm(c):
    """Row tile for the fused ConvNeXt block kernels (fits 32 MiB scoped VMEM)."""
    if c <= 192:
        return 256
    if c <= 384:
        return 128
    return 64


# --------------------------- linear (pointwise conv) -------------------------

@lru_cache(maxsize=None)
def _build_linear(npad, cin, cout, tm, act, has_bias, has_pre, has_res,
                  has_post, eps, out_dtype_name):
    out_dtype = jnp.dtype(out_dtype_name)

    def kernel(*refs):
        i = 0
        x_ref = refs[i]; i += 1
        w_ref = refs[i]; i += 1
        b_ref = None
        if has_bias:
            b_ref = refs[i]; i += 1
        pg_ref = pb_ref = None
        if has_pre:
            pg_ref, pb_ref = refs[i], refs[i + 1]; i += 2
        r_ref = None
        if has_res:
            r_ref = refs[i]; i += 1
        qg_ref = qb_ref = None
        if has_post:
            qg_ref, qb_ref = refs[i], refs[i + 1]; i += 2
        o_ref = refs[i]

        x = x_ref[...].astype(jnp.float32)
        if has_pre:                                   # fused pre-LayerNorm
            mu = jnp.mean(x, axis=-1, keepdims=True)
            var = jnp.mean((x - mu) ** 2, axis=-1, keepdims=True)
            x = (x - mu) * lax.rsqrt(var + eps) * pg_ref[...] + pb_ref[...]
        y = jnp.dot(x.astype(jnp.bfloat16), w_ref[...],
                    preferred_element_type=jnp.float32)
        if has_bias:
            y = y + b_ref[...]
        if act == "gelu":
            # TODO(synk): torch nn.GELU is exact-erf; tanh approximation here.
            y = jax.nn.gelu(y, approximate=True)
        elif act == "relu":
            y = jnp.maximum(y, 0.0)
        if has_res:
            y = y + r_ref[...].astype(jnp.float32)
        if has_post:                                  # fused post-LayerNorm
            mu = jnp.mean(y, axis=-1, keepdims=True)
            var = jnp.mean((y - mu) ** 2, axis=-1, keepdims=True)
            y = (y - mu) * lax.rsqrt(var + eps) * qg_ref[...] + qb_ref[...]
        o_ref[...] = y.astype(o_ref.dtype)

    row = lambda i: (i, 0)
    const = lambda i: (0, 0)
    in_specs = [pl.BlockSpec((tm, cin), row),
                pl.BlockSpec((cin, cout), const)]
    if has_bias:
        in_specs.append(pl.BlockSpec((1, cout), const))
    if has_pre:
        in_specs += [pl.BlockSpec((1, cin), const), pl.BlockSpec((1, cin), const)]
    if has_res:
        in_specs.append(pl.BlockSpec((tm, cout), row))
    if has_post:
        in_specs += [pl.BlockSpec((1, cout), const), pl.BlockSpec((1, cout), const)]

    call = pl.pallas_call(
        kernel,
        out_shape=jax.ShapeDtypeStruct((npad, cout), out_dtype),
        grid=(npad // tm,),
        in_specs=in_specs,
        out_specs=pl.BlockSpec((tm, cout), row),
        compiler_params=_cparams(1))
    return jax.jit(call)


def linear(x, w, b=None, act="none", pre_ln=None, residual=None, post_ln=None,
           eps=1e-6, out_dtype=jnp.float32, tm=256):
    """Row-tiled x @ w (+bias, act, residual, fused pre/post LayerNorm)."""
    n, cin = x.shape
    cout = w.shape[1]
    npad, tm_eff = _row_tiling(n, tm)
    if npad != n:
        x = jnp.pad(x, ((0, npad - n), (0, 0)))
        if residual is not None:
            residual = jnp.pad(residual, ((0, npad - n), (0, 0)))
    ops = [x, w.astype(jnp.bfloat16)]
    if b is not None:
        ops.append(b.reshape(1, cout).astype(jnp.float32))
    if pre_ln is not None:
        g, bb = pre_ln
        ops += [g.reshape(1, cin), bb.reshape(1, cin)]
    if residual is not None:
        ops.append(residual)
    if post_ln is not None:
        g, bb = post_ln
        ops += [g.reshape(1, cout), bb.reshape(1, cout)]
    call = _build_linear(npad, cin, cout, tm_eff, act, b is not None,
                         pre_ln is not None, residual is not None,
                         post_ln is not None, float(eps),
                         jnp.dtype(out_dtype).name)
    out = call(*ops)
    return out if npad == n else out[:n]


# --------------------------------- LayerNorm ---------------------------------

@lru_cache(maxsize=None)
def _build_layernorm(npad, c, tm, eps):
    def kernel(x_ref, g_ref, b_ref, o_ref):
        x = x_ref[...]
        mu = jnp.mean(x, axis=-1, keepdims=True)
        var = jnp.mean((x - mu) ** 2, axis=-1, keepdims=True)
        o_ref[...] = (x - mu) * lax.rsqrt(var + eps) * g_ref[...] + b_ref[...]

    row = lambda i: (i, 0)
    const = lambda i: (0, 0)
    return jax.jit(pl.pallas_call(
        kernel,
        out_shape=jax.ShapeDtypeStruct((npad, c), jnp.float32),
        grid=(npad // tm,),
        in_specs=[pl.BlockSpec((tm, c), row),
                  pl.BlockSpec((1, c), const),
                  pl.BlockSpec((1, c), const)],
        out_specs=pl.BlockSpec((tm, c), row),
        compiler_params=_cparams(1)))


def layernorm(x, g, b, eps=1e-6):
    n, c = x.shape
    npad, tm = _row_tiling(n)
    if npad != n:
        x = jnp.pad(x, ((0, npad - n), (0, 0)))
    out = _build_layernorm(npad, c, tm, float(eps))(x, g.reshape(1, c),
                                                    b.reshape(1, c))
    return out if npad == n else out[:n]


# ----------------------- fused ConvNeXtV2 block kernels ----------------------

@lru_cache(maxsize=None)
def _build_block_pass1(npad, c, tm, n_valid):
    """dwconv(27 taps, in-kernel mask) + LN + pw1 + GELU + GRN sumsq partials."""
    c4 = 4 * c
    n_tiles = npad // tm

    def kernel(g_ref, idx_ref, dww_ref, dwb_ref, lg_ref, lb_ref, w1_ref, b1_ref,
               h_ref, ss_ref):
        idxs = idx_ref[...]                                   # [tm, 27] i32
        dww = dww_ref[...]                                    # [27, c]  f32
        acc = jnp.zeros((tm, c), jnp.float32) + dwb_ref[...]
        for k in range(27):
            valid = (idxs[:, k:k + 1] >= 0).astype(jnp.float32)      # [tm, 1]
            w_row = dww[k:k + 1, :]                                   # [1, c]
            acc = acc + g_ref[k].astype(jnp.float32) * (valid * w_row)
        # LayerNorm (eps 1e-6)
        mu = jnp.mean(acc, axis=-1, keepdims=True)
        var = jnp.mean((acc - mu) ** 2, axis=-1, keepdims=True)
        xn = (acc - mu) * lax.rsqrt(var + 1e-6) * lg_ref[...] + lb_ref[...]
        # pw1 + GELU
        h = jnp.dot(xn.astype(jnp.bfloat16), w1_ref[...],
                    preferred_element_type=jnp.float32) + b1_ref[...]
        # TODO(synk): torch nn.GELU is exact-erf; tanh approximation here.
        h = jax.nn.gelu(h, approximate=True)
        h_ref[...] = h.astype(h_ref.dtype)
        # GRN per-channel sum-of-squares over *valid* rows of this tile
        rows = lax.broadcasted_iota(jnp.int32, (tm, 1), 0) + pl.program_id(0) * tm
        hm = jnp.where(rows < n_valid, h, 0.0)
        ss = jnp.sum(hm * hm, axis=0, keepdims=True)          # [1, 4c]
        ss_ref[...] = jnp.broadcast_to(ss[None, :, :], (1, 8, c4))

    row = lambda i: (i, 0)
    const = lambda i: (0, 0)
    return jax.jit(pl.pallas_call(
        kernel,
        out_shape=(jax.ShapeDtypeStruct((npad, c4), jnp.bfloat16),
                   jax.ShapeDtypeStruct((n_tiles, 8, c4), jnp.float32)),
        grid=(n_tiles,),
        in_specs=[pl.BlockSpec((27, tm, c), lambda i: (0, i, 0)),
                  pl.BlockSpec((tm, 27), row),
                  pl.BlockSpec((27, c), const),
                  pl.BlockSpec((1, c), const),
                  pl.BlockSpec((1, c), const),
                  pl.BlockSpec((1, c), const),
                  pl.BlockSpec((c, c4), const),
                  pl.BlockSpec((1, c4), const)],
        out_specs=(pl.BlockSpec((tm, c4), row),
                   pl.BlockSpec((1, 8, c4), lambda i: (i, 0, 0))),
        compiler_params=_cparams(1)))


@lru_cache(maxsize=None)
def _build_block_pass2(npad, c, tm):
    """GRN apply + pw2 + residual."""
    c4 = 4 * c

    def kernel(h_ref, nx_ref, gg_ref, gb_ref, w2_ref, b2_ref, x_ref, o_ref):
        h = h_ref[...].astype(jnp.float32)
        hg = gg_ref[...] * (h * nx_ref[...]) + gb_ref[...] + h
        z = jnp.dot(hg.astype(jnp.bfloat16), w2_ref[...],
                    preferred_element_type=jnp.float32) + b2_ref[...]
        o_ref[...] = x_ref[...] + z

    row = lambda i: (i, 0)
    const = lambda i: (0, 0)
    return jax.jit(pl.pallas_call(
        kernel,
        out_shape=jax.ShapeDtypeStruct((npad, c), jnp.float32),
        grid=(npad // tm,),
        in_specs=[pl.BlockSpec((tm, c4), row),
                  pl.BlockSpec((1, c4), const),
                  pl.BlockSpec((1, c4), const),
                  pl.BlockSpec((1, c4), const),
                  pl.BlockSpec((c4, c), const),
                  pl.BlockSpec((1, c), const),
                  pl.BlockSpec((tm, c), row)],
        out_specs=pl.BlockSpec((tm, c), row),
        compiler_params=_cparams(1)))


# --------------------- sparse-conv host-side index glue ----------------------

_NBR_CACHE = {}


def _neighbor_indices(coords):
    key = coords.tobytes()
    if key in _NBR_CACHE:
        return _NBR_CACHE[key]
    clist = [tuple(int(v) for v in row) for row in coords]
    table = {c: i for i, c in enumerate(clist)}
    offsets = [(dx, dy, dz) for dx in (-1, 0, 1) for dy in (-1, 0, 1)
               for dz in (-1, 0, 1)]
    n = len(clist)
    idx = np.full((27, n), -1, dtype=np.int32)
    for k, (dx, dy, dz) in enumerate(offsets):
        for i, (b, x, y, z) in enumerate(clist):
            j = table.get((b, x + dx, y + dy, z + dz))
            if j is not None:
                idx[k, i] = j
    _NBR_CACHE[key] = idx
    return idx


def _downsample_map(coords):
    parent = coords.copy()
    parent[:, 1:] = parent[:, 1:] // 2
    off = coords[:, 1:] - parent[:, 1:] * 2
    k_idx = (off[:, 0] * 4 + off[:, 1] * 2 + off[:, 2]).astype(np.int32)
    out_coords, inv = np.unique(parent, axis=0, return_inverse=True)
    return out_coords, np.asarray(inv).reshape(-1).astype(np.int32), k_idx


# ----------------------------- ConvNeXtV2 block -------------------------------

def block_fwd(p, x_pad, n, nbr_idx):
    """dwconv -> LN -> pw1 -> GELU -> GRN -> pw2 -> residual (drop_path=0)."""
    npad, c = x_pad.shape
    tm = _block_tm(c)
    c4 = 4 * c
    idx_pad = np.full((27, npad), -1, np.int32)
    idx_pad[:, :nbr_idx.shape[1]] = nbr_idx
    # Neighbour gather in plain JAX (bf16), masking done in-kernel from indices.
    # TODO(synk): replace with in-kernel DMA gather via scalar-prefetched indices.
    g = jnp.take(x_pad, jnp.asarray(np.maximum(idx_pad, 0)),
                 axis=0).astype(jnp.bfloat16)                   # [27, npad, c]
    idx_t = jnp.asarray(np.ascontiguousarray(idx_pad.T))        # [npad, 27]

    h, ss = _build_block_pass1(npad, c, tm, int(n))(
        g, idx_t, p["dw_w"], p["dw_b"].reshape(1, c),
        p["ln_g"].reshape(1, c), p["ln_b"].reshape(1, c),
        p["pw1_w"], p["pw1_b"].reshape(1, c4))

    gx = jnp.sqrt(jnp.sum(ss[:, 0, :], axis=0))                 # [4c] global L2
    nx = (gx / (jnp.mean(gx) + 1e-6)).reshape(1, c4)

    return _build_block_pass2(npad, c, tm)(
        h, nx, p["grn_g"].reshape(1, c4), p["grn_b"].reshape(1, c4),
        p["pw2_w"], p["pw2_b"].reshape(1, c), x_pad)


# ---------------------- sparse stride-2 (transpose) convs ---------------------

def sparse_down_conv(x_pad, coords, dp):
    """LN + MinkowskiConvolution(k=stride=2): host sort by offset ->
    8 contiguous grouped matmuls (LN fused) -> scatter-add to parents."""
    out_coords, inv, k_idx = _downsample_map(coords)
    n_out = out_coords.shape[0]
    order = np.argsort(k_idx, kind="stable")
    counts = np.bincount(k_idx, minlength=8)
    x_sorted = jnp.take(x_pad, jnp.asarray(order.astype(np.int32)), axis=0)
    pieces, off = [], 0
    for k in range(8):
        cnt = int(counts[k])
        if cnt == 0:
            continue
        pieces.append(linear(x_sorted[off:off + cnt], dp["w"][k],
                             pre_ln=(dp["ln_g"], dp["ln_b"]), eps=1e-6))
        off += cnt
    y_sorted = pieces[0] if len(pieces) == 1 else jnp.concatenate(pieces, axis=0)
    seg = jnp.asarray(inv[order].astype(np.int32))
    out = jax.ops.segment_sum(y_sorted, seg, num_segments=n_out) + dp["b"][None, :]
    npad_out = _round_up(max(n_out, 1), LEVEL_PAD)
    out = jnp.pad(out, ((0, npad_out - n_out), (0, 0)))
    return out, n_out, out_coords


def sparse_up_conv(x_pad, coarse_coords, fine_coords, up):
    """LN + MinkowskiConvolutionTranspose(k=stride=2) onto the existing fine
    coordinate map, as a grouped matmul over the 8 child offsets."""
    table = {tuple(int(v) for v in row): i for i, row in enumerate(coarse_coords)}
    parent = fine_coords.copy()
    parent[:, 1:] = parent[:, 1:] // 2
    pidx = np.array([table[tuple(int(v) for v in row)] for row in parent],
                    np.int32)
    off = fine_coords[:, 1:] - parent[:, 1:] * 2
    k_idx = (off[:, 0] * 4 + off[:, 1] * 2 + off[:, 2]).astype(np.int32)
    order = np.argsort(k_idx, kind="stable")
    counts = np.bincount(k_idx, minlength=8)
    gathered = jnp.take(x_pad, jnp.asarray(pidx[order]), axis=0)
    pieces, o = [], 0
    for k in range(8):
        cnt = int(counts[k])
        if cnt == 0:
            continue
        pieces.append(linear(gathered[o:o + cnt], up["w"][k],
                             pre_ln=(up["ln_g"], up["ln_b"]), eps=1e-6))
        o += cnt
    y_sorted = pieces[0] if len(pieces) == 1 else jnp.concatenate(pieces, axis=0)
    inv_order = np.argsort(order).astype(np.int32)
    y = jnp.take(y_sorted, jnp.asarray(inv_order), axis=0) + up["b"][None, :]
    n_fine = fine_coords.shape[0]
    npad = _round_up(max(n_fine, 1), LEVEL_PAD)
    return jnp.pad(y, ((0, npad - n_fine), (0, 0)))


# --------------------------------- attention ----------------------------------

@lru_cache(maxsize=None)
def _build_attention(b, s, d, nhead):
    dh = d // nhead
    scale = 1.0 / math.sqrt(dh)

    def kernel(qkv_ref, co_ref, kb_ref, rs_ref, o_ref):
        qkv = qkv_ref[0]                                   # [s, 3d] bf16
        co = co_ref[0]                                     # [s, 3]  f32
        kb = kb_ref[0]                                     # [1, s]  f32 (0 / -1e9)
        rs = rs_ref[...]                                   # [1, nhead] f32
        # squared pairwise distances from O(s) coordinate data (no [s,s] DMA)
        d2 = jnp.zeros((s, s), jnp.float32)
        for a in range(3):
            ca = co[:, a:a + 1]
            diff = ca - jnp.transpose(ca)
            d2 = d2 + diff * diff
        dist = jnp.sqrt(d2 + 1e-12)
        outs = []
        for h in range(nhead):
            qh = qkv[:, h * dh:(h + 1) * dh]
            kh = qkv[:, d + h * dh:d + (h + 1) * dh]
            vh = qkv[:, 2 * d + h * dh:2 * d + (h + 1) * dh]
            sc = lax.dot_general(qh, kh, (((1,), (1,)), ((), ())),
                                 preferred_element_type=jnp.float32) * scale
            sc = sc - dist * rs[:, h:h + 1] + kb
            sc = sc - jnp.max(sc, axis=-1, keepdims=True)
            pr = jnp.exp(sc)
            pr = pr * pl.reciprocal(jnp.sum(pr, axis=-1, keepdims=True),
                                    approx=True)
            outs.append(lax.dot_general(pr.astype(jnp.bfloat16), vh,
                                        (((1,), (0,)), ((), ())),
                                        preferred_element_type=jnp.float32))
        o_ref[0] = jnp.concatenate(outs, axis=-1).astype(o_ref.dtype)

    blk = lambda i: (i, 0, 0)
    return jax.jit(pl.pallas_call(
        kernel,
        out_shape=jax.ShapeDtypeStruct((b, s, d), jnp.bfloat16),
        grid=(b,),
        in_specs=[pl.BlockSpec((1, s, 3 * d), blk),
                  pl.BlockSpec((1, s, 3), blk),
                  pl.BlockSpec((1, 1, s), blk),
                  pl.BlockSpec((1, nhead), lambda i: (0, 0))],
        out_specs=pl.BlockSpec((1, s, d), blk),
        compiler_params=_cparams(1)))


def encoder_layer(p, x, coords, key_bias, rel_scale, eps=1e-5):
    """Post-LN transformer encoder layer (fused QKV, in-kernel bias, relu FFN)."""
    B, S, D = x.shape
    x2 = x.reshape(B * S, D)
    qkv = linear(x2, p["wqkv"], p["bqkv"],
                 out_dtype=jnp.bfloat16).reshape(B, S, 3 * D)
    attn = _build_attention(B, S, D, NHEAD)(qkv, coords, key_bias, rel_scale)
    y = linear(attn.reshape(B * S, D), p["wo"], p["bo"], residual=x2,
               post_ln=(p["ln1_g"], p["ln1_b"]), eps=eps)
    h = linear(y, p["ff1_w"], p["ff1_b"], act="relu")
    y = linear(h, p["ff2_w"], p["ff2_b"], residual=y,
               post_ln=(p["ln2_g"], p["ln2_b"]), eps=eps)
    return y.reshape(B, S, D)


def relpos_transformer(layers, seq, coords, key_mask):
    # TODO(synk): RelPosTransformer source not provided; approximated as a 2-layer
    # post-LN encoder with a per-head distance-proportional attention bias.
    B, S, _ = seq.shape
    key_bias = jnp.where(key_mask, -1e9, 0.0).astype(jnp.float32).reshape(B, 1, S)
    x = seq
    for p in layers:
        x = encoder_layer(p, x, coords, key_bias, p["rel_scale"].reshape(1, NHEAD))
    return x


def global_feats_encoder(p, x_glob):
    # TODO(synk): GlobalFeatureEncoder source not provided; approximated as 2-layer MLP.
    h = linear(x_glob, p["w1"], p["b1"], act="gelu")
    return linear(h, p["w2"], p["b2"])


# ----------------------------------- heads ------------------------------------

def head_fwd(hp, x_pad, n, nbr_idx, cout):
    h = layernorm(x_pad, hp["ln_g"], hp["ln_b"], eps=1e-6)
    h = block_fwd(hp["block"], h, n, nbr_idx)
    y = linear(h, hp["head_w"])          # head weight padded to 128 output lanes
    return y[:n, :cout]


# ------------------------------- parameters -----------------------------------

class _Init:
    def __init__(self, seed):
        self.key = jax.random.PRNGKey(seed)

    def normal(self, shape, scale=0.02, dtype=jnp.float32):
        self.key, k = jax.random.split(self.key)
        return (scale * jax.random.normal(k, shape, jnp.float32)).astype(dtype)


def init_params(in_channels, glob_dim, seed=1234):
    init = _Init(seed)
    d = ENC_DIMS[-1]
    bf = jnp.bfloat16
    zeros = lambda n: jnp.zeros((n,), jnp.float32)
    ones = lambda n: jnp.ones((n,), jnp.float32)

    def block(dim):
        return dict(dw_w=init.normal((27, dim)), dw_b=zeros(dim),
                    ln_g=ones(dim), ln_b=zeros(dim),
                    pw1_w=init.normal((dim, 4 * dim), dtype=bf),
                    pw1_b=zeros(4 * dim),
                    grn_g=zeros(4 * dim), grn_b=zeros(4 * dim),
                    pw2_w=init.normal((4 * dim, dim), dtype=bf),
                    pw2_b=zeros(dim))

    def enc_layer(dm, dff):
        return dict(wqkv=init.normal((dm, 3 * dm), dtype=bf), bqkv=zeros(3 * dm),
                    wo=init.normal((dm, dm), dtype=bf), bo=zeros(dm),
                    ln1_g=ones(dm), ln1_b=zeros(dm),
                    ln2_g=ones(dm), ln2_b=zeros(dm),
                    ff1_w=init.normal((dm, dff), dtype=bf), ff1_b=zeros(dff),
                    ff2_w=init.normal((dff, dm), dtype=bf), ff2_b=zeros(dm))

    def head(dim, cout):
        w = init.normal((dim, cout))
        return dict(ln_g=ones(dim), ln_b=zeros(dim), block=block(dim),
                    head_w=jnp.pad(w, ((0, 0), (0, 128 - cout))).astype(bf))

    P = dict(
        stem_w=init.normal((in_channels, ENC_DIMS[0]), dtype=bf),
        stem_ln_g=ones(ENC_DIMS[0]), stem_ln_b=zeros(ENC_DIMS[0]),
        enc=[[block(ENC_DIMS[i]) for _ in range(ENC_DEPTHS[i])] for i in range(4)],
        down=[dict(ln_g=ones(ENC_DIMS[i]), ln_b=zeros(ENC_DIMS[i]),
                   w=init.normal((8, ENC_DIMS[i], ENC_DIMS[i + 1]), dtype=bf),
                   b=zeros(ENC_DIMS[i + 1])) for i in range(3)],
        cls_mod=jnp.zeros((1, 1, d), jnp.float32),
        empty_mod_emb=jnp.zeros((d,), jnp.float32),
        mod_tr=[dict(enc_layer(d, 2048),
                     rel_scale=jnp.full((NHEAD,), 0.1, jnp.float32))
                for _ in range(2)],
        glob=dict(w1=init.normal((glob_dim, d), dtype=bf), b1=zeros(d),
                  w2=init.normal((d, d), dtype=bf), b2=zeros(d)),
        evt_tr=[enc_layer(d, 2048) for _ in range(5)],
        pos_embed=init.normal((NUM_MODULES, d), scale=1.0),
        up=[dict(ln_g=ones(DEC_DIMS[i]), ln_b=zeros(DEC_DIMS[i]),
                 w=init.normal((8, DEC_DIMS[i], DEC_DIMS[i + 1]), dtype=bf),
                 b=zeros(DEC_DIMS[i + 1])) for i in range(3)],
        dec=[[block(DEC_DIMS[i + 1]) for _ in range(DEC_DEPTHS[i])]
             for i in range(3)],
        prim=head(DEC_DIMS[-1], 1),
        seg=head(DEC_DIMS[-1], 3),
    )
    return P


# ---------------------------------- forward -----------------------------------

def forward(P, feats, coords, x_glob, module_to_event, module_pos):
    d = ENC_DIMS[-1]
    n0 = feats.shape[0]
    npad0 = _round_up(max(n0, 1), LEVEL_PAD)
    x = jnp.pad(feats, ((0, npad0 - n0), (0, 0)))

    # ---- stem: 1x1 conv (no bias) + LayerNorm fused into one tiled kernel ----
    x = linear(x, P["stem_w"], post_ln=(P["stem_ln_g"], P["stem_ln_b"]), eps=1e-6)

    cur_coords, cur_n = coords, n0
    x_enc = []
    for i in range(4):
        nbr = _neighbor_indices(cur_coords)
        for bp in P["enc"][i]:
            x = block_fwd(bp, x, cur_n, nbr)
        if i < 3:
            x_enc.append((x, cur_n, cur_coords))
            x, cur_n, cur_coords = sparse_down_conv(x, cur_coords, P["down"][i])

    # ---- group deepest-level voxels per module, module transformer ----
    feats_all = x[:cur_n]
    batch_ids = cur_coords[:, 0].astype(np.int64)
    M = len(module_to_event)
    groups = [np.nonzero(batch_ids == m)[0] for m in range(M)]
    lengths = np.array([g.size for g in groups], np.int64)
    L = max(int(lengths.max()), 1)

    padded_feats = jnp.zeros((M, L, d), jnp.float32)
    padded_coords = np.zeros((M, L, 3), np.float32)
    for m, g in enumerate(groups):
        if g.size:
            padded_feats = padded_feats.at[m, :g.size].set(
                jnp.take(feats_all, jnp.asarray(g.astype(np.int32)), axis=0))
            padded_coords[m, :g.size] = cur_coords[g, 1:].astype(np.float32)
    pad_mask = np.arange(L)[None, :] >= lengths[:, None]

    cls = jnp.broadcast_to(P["cls_mod"], (M, 1, d))
    seq_mod = jnp.concatenate([cls, padded_feats], axis=1)          # [M, L+1, d]
    key_mask = jnp.asarray(np.concatenate(
        [np.zeros((M, 1), bool), pad_mask], axis=1))
    seq_coords = jnp.asarray(np.concatenate(
        [np.zeros((M, 1, 3), np.float32), padded_coords], axis=1))
    mod_out = relpos_transformer(P["mod_tr"], seq_mod, seq_coords, key_mask)
    mod_emb = mod_out[:, 0, :]                                       # [M, d]

    # ---- event transformer ----
    B = int(module_to_event.max()) + 1
    ev_idx = jnp.asarray(module_to_event.astype(np.int32))
    mo_idx = jnp.asarray(module_pos.astype(np.int32))
    pad_evt = jnp.broadcast_to(P["empty_mod_emb"][None, None, :],
                               (B, NUM_MODULES, d))
    pad_evt = pad_evt.at[ev_idx, mo_idx].set(mod_emb)
    seq_evt = pad_evt + P["pos_embed"][None, :, :]
    glob_emb = global_feats_encoder(P["glob"], x_glob)[:, None, :]
    seq_evt = jnp.concatenate([glob_emb, seq_evt], axis=1)           # [B, 16, d]
    S_evt = seq_evt.shape[1]
    zero_coords = jnp.zeros((B, S_evt, 3), jnp.float32)
    zero_kb = jnp.zeros((B, 1, S_evt), jnp.float32)
    zero_rs = jnp.zeros((1, NHEAD), jnp.float32)
    evt_out = seq_evt
    for lp in P["evt_tr"]:
        evt_out = encoder_layer(lp, evt_out, zero_coords, zero_kb, zero_rs)
    updated_mod_emb = evt_out[ev_idx, 1 + mo_idx, :]                 # [M, d]

    # ---- scatter transformer context back to voxels ----
    voxel_mod_feat = jnp.zeros((cur_n, d), jnp.float32)
    for m, g in enumerate(groups):
        if g.size:
            voxel_mod_feat = voxel_mod_feat.at[jnp.asarray(g.astype(np.int32))].set(
                mod_out[m, 1:1 + g.size, :])
    module_ctx = jnp.take(updated_mod_emb,
                          jnp.asarray(batch_ids.astype(np.int32)), axis=0)
    x = voxel_mod_feat + module_ctx
    npad = _round_up(max(cur_n, 1), LEVEL_PAD)
    x = jnp.pad(x, ((0, npad - cur_n), (0, 0)))

    # ---- decoder ----
    x_enc = x_enc[::-1]
    for i in range(3):
        skip_feats, skip_n, skip_coords = x_enc[i]
        x = sparse_up_conv(x, cur_coords, skip_coords, P["up"][i])
        cur_coords, cur_n = skip_coords, skip_n
        x = x + skip_feats
        nbr = _neighbor_indices(cur_coords)
        for bp in P["dec"][i]:
            x = block_fwd(bp, x, cur_n, nbr)

    # ---- heads ----
    nbr = _neighbor_indices(cur_coords)
    out_prim = head_fwd(P["prim"], x, cur_n, nbr, 1)
    out_seg = head_fwd(P["seg"], x, cur_n, nbr, 3)
    return {"out_primlepton": out_prim, "out_seg": out_seg}


# ------------------------------------ main ------------------------------------

if __name__ == "__main__":
    in_channels = 4
    glob_dim = 16
    num_modules_present = 4          # 2 events x 2 occupied modules
    voxels_per_module = 48
    extent = 16

    # deterministic sparse coordinates (host-side numpy glue)
    rng = np.random.default_rng(0)
    all_xyz = np.stack(np.meshgrid(np.arange(extent), np.arange(extent),
                                   np.arange(extent), indexing="ij"),
                       -1).reshape(-1, 3)
    coords_list = []
    for m in range(num_modules_present):
        sel = rng.choice(all_xyz.shape[0], size=voxels_per_module, replace=False)
        xyz = all_xyz[np.sort(sel)]
        coords_list.append(np.concatenate(
            [np.full((voxels_per_module, 1), m, np.int64),
             xyz.astype(np.int64)], axis=1))
    coords = np.concatenate(coords_list, axis=0)           # [N, 4]
    N = coords.shape[0]

    # deterministic feature inputs
    key = jax.random.PRNGKey(0)
    k_feat, k_glob = jax.random.split(key)
    feats = jax.random.normal(k_feat, (N, in_channels), jnp.float32)
    x_glob = jax.random.normal(k_glob, (2, glob_dim), jnp.float32)
    module_to_event = np.array([0, 0, 1, 1], np.int32)
    module_pos = np.array([0, 1, 0, 1], np.int32)

    params = init_params(in_channels, glob_dim)
    out = forward(params, feats, coords, x_glob, module_to_event, module_pos)
    jax.block_until_ready(out["out_primlepton"])
    jax.block_until_ready(out["out_seg"])

    assert out["out_primlepton"].shape == (N, 1)
    assert out["out_seg"].shape == (N, 3)
    assert bool(jnp.all(jnp.isfinite(out["out_primlepton"])))
    assert bool(jnp.all(jnp.isfinite(out["out_seg"])))
    print("KERNEL_OK")
</pallas_src>

<mosaic_0001>
module attributes {stable_mosaic.version = 11 : i64} {
  func.func @kernel(%arg0: i32, %arg1: memref<256x4xf32, #tpu.memory_space<vmem>>, %arg2: memref<4x96xbf16, #tpu.memory_space<vmem>>, %arg3: memref<1x96xf32, #tpu.memory_space<vmem>>, %arg4: memref<1x96xf32, #tpu.memory_space<vmem>>, %arg5: memref<256x96xf32, #tpu.memory_space<vmem>>) attributes {dimension_semantics = [#tpu.dimension_semantics<parallel>], iteration_bounds = array<i64: 1>, scalar_prefetch = 0 : i64, scratch_operands = 0 : i64, tpu.core_type = #tpu.core_type<tc>, window_params = [{transform_indices = @transform_0, window_bounds = array<i64: 256, 4>}, {pipeline_mode = #tpu.pipeline_mode<synchronous>, transform_indices = @transform_1, window_bounds = array<i64: 4, 96>}, {pipeline_mode = #tpu.pipeline_mode<synchronous>, transform_indices = @transform_2, window_bounds = array<i64: 1, 96>}, {pipeline_mode = #tpu.pipeline_mode<synchronous>, transform_indices = @transform_3, window_bounds = array<i64: 1, 96>}, {transform_indices = @transform_4, window_bounds = array<i64: 256, 96>}]} {
    %c0 = arith.constant 0 : index
    %c0_0 = arith.constant 0 : index
    %0 = vector.load %arg1[%c0, %c0_0] : memref<256x4xf32, #tpu.memory_space<vmem>>, vector<256x4xf32>
    %1 = arith.truncf %0 : vector<256x4xf32> to vector<256x4xbf16>
    %c0_1 = arith.constant 0 : index
    %c0_2 = arith.constant 0 : index
    %2 = vector.load %arg2[%c0_1, %c0_2] : memref<4x96xbf16, #tpu.memory_space<vmem>>, vector<4x96xbf16>
    %cst = arith.constant dense<0.000000e+00> : vector<256x96xf32>
    %3 = tpu.matmul %1, %2, %cst {dimension_numbers = #tpu.dot_dimension_numbers<[1], [0], [0], [1], [0, 0, 1, 1], [], []>} : vector<256x4xbf16>, vector<4x96xbf16>, vector<256x96xf32> -> vector<256x96xf32>
    %cst_3 = arith.constant dense<0.000000e+00> : vector<256xf32>
    %4 = vector.multi_reduction <add>, %3, %cst_3 [1] : vector<256x96xf32> to vector<256xf32>
    %5 = vector.shape_cast %4 : vector<256xf32> to vector<256x1xf32>
    %cst_4 = arith.constant 9.600000e+01 : f32
    %6 = vector.broadcast %cst_4 : f32 to vector<256x1xf32>
    %7 = arith.divf %5, %6 : vector<256x1xf32>
    %8 = vector.broadcast %7 : vector<256x1xf32> to vector<256x96xf32>
    %9 = arith.subf %3, %8 : vector<256x96xf32>
    %10 = arith.mulf %9, %9 : vector<256x96xf32>
    %cst_5 = arith.constant dense<0.000000e+00> : vector<256xf32>
    %11 = vector.multi_reduction <add>, %10, %cst_5 [1] : vector<256x96xf32> to vector<256xf32>
    %12 = vector.shape_cast %11 : vector<256xf32> to vector<256x1xf32>
    %cst_6 = arith.constant 9.600000e+01 : f32
    %13 = vector.broadcast %cst_6 : f32 to vector<256x1xf32>
    %14 = arith.divf %12, %13 : vector<256x1xf32>
    %15 = vector.broadcast %7 : vector<256x1xf32> to vector<256x96xf32>
    %16 = arith.subf %3, %15 : vector<256x96xf32>
    %cst_7 = arith.constant 9.99999997E-7 : f32
    %17 = vector.broadcast %cst_7 : f32 to vector<256x1xf32>
    %18 = arith.addf %14, %17 : vector<256x1xf32>
    %19 = math.rsqrt %18 : vector<256x1xf32>
    %20 = vector.broadcast %19 : vector<256x1xf32> to vector<256x96xf32>
    %21 = arith.mulf %16, %20 : vector<256x96xf32>
    %c0_8 = arith.constant 0 : index
    %c0_9 = arith.constant 0 : index
    %22 = vector.load %arg3[%c0_8, %c0_9] : memref<1x96xf32, #tpu.memory_space<vmem>>, vector<1x96xf32>
    %23 = vector.broadcast %22 : vector<1x96xf32> to vector<256x96xf32>
    %24 = arith.mulf %21, %23 : vector<256x96xf32>
    %c0_10 = arith.constant 0 : index
    %c0_11 = arith.constant 0 : index
    %25 = vector.load %arg4[%c0_10, %c0_11] : memref<1x96xf32, #tpu.memory_space<vmem>>, vector<1x96xf32>
    %26 = vector.broadcast %25 : vector<1x96xf32> to vector<256x96xf32>
    %27 = arith.addf %24, %26 : vector<256x96xf32>
    %c0_12 = arith.constant 0 : index
    %c0_13 = arith.constant 0 : index
    %28 = vector.load %arg5[%c0_12, %c0_13] : memref<256x96xf32, #tpu.memory_space<vmem>>, vector<256x96xf32>
    tpu.vector_store %arg5[%c0_12, %c0_13], %27 {strides = array<i32>} : memref<256x96xf32, #tpu.memory_space<vmem>>, vector<256x96xf32>,
    return
  }
  func.func @transform_0(%arg0: i32) -> (i32, i32) {
    %c0_i32 = arith.constant 0 : i32
    %c0_i32_0 = arith.constant 0 : i32
    return %arg0, %c0_i32 : i32, i32
  }
  func.func @transform_1(%arg0: i32) -> (i32, i32) {
    %c0_i32 = arith.constant 0 : i32
    %c0_i32_0 = arith.constant 0 : i32
    %c0_i32_1 = arith.constant 0 : i32
    return %c0_i32, %c0_i32_0 : i32, i32
  }
  func.func @transform_2(%arg0: i32) -> (i32, i32) {
    %c0_i32 = arith.constant 0 : i32
    %c0_i32_0 = arith.constant 0 : i32
    %c0_i32_1 = arith.constant 0 : i32
    return %c0_i32, %c0_i32_0 : i32, i32
  }
  func.func @transform_3(%arg0: i32) -> (i32, i32) {
    %c0_i32 = arith.constant 0 : i32
    %c0_i32_0 = arith.constant 0 : i32
    %c0_i32_1 = arith.constant 0 : i32
    return %c0_i32, %c0_i32_0 : i32, i32
  }
  func.func @transform_4(%arg0: i32) -> (i32, i32) {
    %c0_i32 = arith.constant 0 : i32
    %c0_i32_0 = arith.constant 0 : i32
    return %arg0, %c0_i32 : i32, i32
  }
}

</mosaic_0001>

<bundles_post_ra>
// kernel: tpu_custom_call.1
= control target key start
LH: loop header
LB: loop body
LE: loop exit
PB: predicated region body
PF: predicated region fallthrough
CT: control target
= control target key end

     0   :  { %vm116_vm0 = vcmask 1041408   ;;  %vm67_vm1 = vcmask 31744   ;;  %vm281_vm2 = vcmask 785408   ;;  %s1644_s1 = inlined_call_operand.vmem [shape: bf16[4,96], index: 1, kind: input, shape index: {}]   ;;  %s1645_s0 = inlined_call_operand.vmem [shape: f32[256,4], index: 0, kind: input, shape index: {}]   ;;  %s1646_s2 = inlined_call_operand.vmem [shape: f32[1,96], index: 2, kind: input, shape index: {}]   ;;  %s1647_s3 = inlined_call_operand.vmem [shape: f32[1,96], index: 3, kind: input, shape index: {}]   ;;  %s1648_s4 = inlined_call_operand.vmem [shape: f32[256,96], index: 4, kind: output, shape index: {}]  }
   0x1   :  { %v66_v0 = vld [vmem:[%s1644_s1] sm:$0x3]  ;;  %v19_v2 = vld [vmem:[%s1645_s0 + $0x8] sm:$0xff]  ;;  %v20_v7 = vld [vmem:[%s1645_s0 + $0x10] sm:$0xff] }
   0x2   :  { %v18_v1 = vld [vmem:[%s1645_s0] sm:$0xff]  ;;  %884 = vmatprep.subr.msk.bf16.mxu0 %vm116_vm0, %v66_v0  ;;  %885 = vmatprep.subr.msk.bf16.mxu1 %vm116_vm0, %v66_v0  ;;  %v118_v3 = vsel %vm116_vm0, %v66_v0, 0  ;;  %v35_v6 = vld [vmem:[%s1645_s0 + $0x88] sm:$0xff]  ;;  %v21_v9 = vld [vmem:[%s1645_s0 + $0x18] sm:$0xff] }
   0x3   :  { %v50_v4 = vpack.c.bf16 %v19_v2, %v18_v1  ;;  %v34_v5 = vld [vmem:[%s1645_s0 + $0x80] sm:$0xff]  ;;  %849 = vmatpush3.bf16.msra.mxu0 %v118_v3  ;;  %883 = vmatpush3.bf16.msra.mxu1 %v118_v3  ;;  %v36_v10 = vld [vmem:[%s1645_s0 + $0x90] sm:$0xff]  ;;  %v37_v11 = vld [vmem:[%s1645_s0 + $0x98] sm:$0xff]  ;;  %v51_v12 = vpack.c.bf16 %v21_v9, %v20_v7 }
   0x4   :  { %v58_v8 = vpack.c.bf16 %v35_v6, %v34_v5  ;;  %v59_v13 = vpack.c.bf16 %v37_v11, %v36_v10  ;;  %v22_v14 = vld [vmem:[%s1645_s0 + $0x20] sm:$0xff]  ;;  %v23_v15 = vld [vmem:[%s1645_s0 + $0x28] sm:$0xff]  ;;  %v24_v19 = vld [vmem:[%s1645_s0 + $0x30] sm:$0xff] }
   0x5   :  { %850 = vmatprep.mubr.msk.bf16.mxu0 %vm67_vm1, %v50_v4  ;;  %v52_v16 = vpack.c.bf16 %v23_v15, %v22_v14  ;;  %v38_v17 = vld [vmem:[%s1645_s0 + $0xa0] sm:$0xff]  ;;  %v39_v18 = vld [vmem:[%s1645_s0 + $0xa8] sm:$0xff]  ;;  %v25_v20 = vld [vmem:[%s1645_s0 + $0x38] sm:$0xff] }
   0x6   :  { %866 = vmatprep.mubr.msk.bf16.mxu1 %vm67_vm1, %v58_v8  ;;  %851 = vmatmul.mubr.msk.bf16.vlgmr.msra.gmra.mrb[0].mxu0 %vm67_vm1, %v51_v12  ;;  %v60_v21 = vpack.c.bf16 %v39_v18, %v38_v17  ;;  %v40_v22 = vld [vmem:[%s1645_s0 + $0xb0] sm:$0xff]  ;;  %v41_v23 = vld [vmem:[%s1645_s0 + $0xb8] sm:$0xff]  ;;  %v26_v24 = vld [vmem:[%s1645_s0 + $0x40] sm:$0xff]  ;;  %v53_v28 = vpack.c.bf16 %v25_v20, %v24_v19 }
   0x7   :  { %867 = vmatmul.mubr.msk.bf16.vlgmr.msra.gmra.mrb[0].mxu1 %vm67_vm1, %v59_v13  ;;  %854 = vmatprep.mubr.msk.bf16.mxu0 %vm67_vm1, %v52_v16  ;;  %v27_v25 = vld [vmem:[%s1645_s0 + $0x48] sm:$0xff]  ;;  %v42_v26 = vld [vmem:[%s1645_s0 + $0xc0] sm:$0xff]  ;;  %v61_v29 = vpack.c.bf16 %v41_v23, %v40_v22  ;;  %v28_v32 = vld [vmem:[%s1645_s0 + $0x50] sm:$0xff] }
   0x8   :  { %870 = vmatprep.mubr.msk.bf16.mxu1 %vm67_vm1, %v60_v21  ;;  %v43_v27 = vld [vmem:[%s1645_s0 + $0xc8] sm:$0xff]  ;;  %v54_v30 = vpack.c.bf16 %v27_v25, %v26_v24  ;;  %v29_v33 = vld [vmem:[%s1645_s0 + $0x58] sm:$0xff]  ;;  %v44_v34 = vld [vmem:[%s1645_s0 + $0xd0] sm:$0xff] }
   0x9   :  { %v62_v31 = vpack.c.bf16 %v43_v27, %v42_v26  ;;  %v45_v35 = vld [vmem:[%s1645_s0 + $0xd8] sm:$0xff]  ;;  %v30_v36 = vld [vmem:[%s1645_s0 + $0x60] sm:$0xff]  ;;  %v31_v37 = vld [vmem:[%s1645_s0 + $0x68] sm:$0xff]  ;;  %v55_v40 = vpack.c.bf16 %v29_v33, %v28_v32 }
   0xa   :  { %v46_v38 = vld [vmem:[%s1645_s0 + $0xe0] sm:$0xff]  ;;  %v47_v39 = vld [vmem:[%s1645_s0 + $0xe8] sm:$0xff]  ;;  %v63_v41 = vpack.c.bf16 %v45_v35, %v44_v34  ;;  %v56_v42 = vpack.c.bf16 %v31_v37, %v30_v36  ;;  %v32_v44 = vld [vmem:[%s1645_s0 + $0x70] sm:$0xff] }
   0xb   :  { %v64_v43 = vpack.c.bf16 %v47_v39, %v46_v38  ;;  %v33_v45 = vld [vmem:[%s1645_s0 + $0x78] sm:$0xff]  ;;  %v48_v46 = vld [vmem:[%s1645_s0 + $0xf0] sm:$0xff] }
   0xc   :  { %v49_v47 = vld [vmem:[%s1645_s0 + $0xf8] sm:$0xff]  ;;  %v57_v48 = vpack.c.bf16 %v33_v45, %v32_v44 }
   0xd   :  { %v65_v49 = vpack.c.bf16 %v49_v47, %v48_v46 }
   0xe   :  { %855 = vmatmul.mubr.msk.bf16.gmra.mrb[4].mxu0 %vm67_vm1, %v53_v28 }
   0xf   :  { %871 = vmatmul.mubr.msk.bf16.gmra.mrb[4].mxu1 %vm67_vm1, %v61_v29  ;;  %858 = vmatprep.mubr.msk.bf16.mxu0 %vm67_vm1, %v54_v30 }
  0x10   :  { %874 = vmatprep.mubr.msk.bf16.mxu1 %vm67_vm1, %v62_v31 }
  0x16   :  { %859 = vmatmul.mubr.msk.bf16.gmra.mrb[8].mxu0 %vm67_vm1, %v55_v40 }
  0x17   :  { %875 = vmatmul.mubr.msk.bf16.gmra.mrb[8].mxu1 %vm67_vm1, %v63_v41  ;;  %862 = vmatprep.mubr.msk.bf16.mxu0 %vm67_vm1, %v56_v42 }
  0x18   :  { %878 = vmatprep.mubr.msk.bf16.mxu1 %vm67_vm1, %v64_v43 }
  0x1e   :  { %863 = vmatmul.mubr.msk.bf16.gmra.mrb[12].mxu0 %vm67_vm1, %v57_v48 }
  0x1f   :  { %879 = vmatmul.mubr.msk.bf16.gmra.mrb[12].mxu1 %vm67_vm1, %v65_v49 }
  0xd9   :  { %v1090_v50 = vpop.f32.mrb[0].mxu0 }
  0xda   :  { %v1092_v51 = vpop.f32.mrb[0].mxu1  ;;  %v1094_v52 = vpop.f32.mrb[1].mxu0  ;;  %v288_v55 = vsel %vm281_vm2, %v1090_v50, 0.0 }
  0xdb   :  { %v1096_v53 = vpop.f32.mrb[1].mxu1  ;;  %v336_v54 = vsel %vm281_vm2, %v1092_v51, 0.0  ;;  %289 = vadd.xlane.f32.xlu1 %v288_v55  ;;  %v1104_v57 = vpop.f32.mrb[2].mxu0  ;;  %v282_v60 = vsel %vm281_vm2, %v1094_v52, 0.0 }
  0xdc   :  { %337 = vadd.xlane.f32.xlu0 %v336_v54  ;;  %v1102_v56 = vpop.f32.mrb[2].mxu1  ;;  %v1106_v58 = vpop.f32.mrb[3].mxu0  ;;  %v291_v61 = vsel %vm281_vm2, %v1104_v57, 0.0  ;;  %v330_v0 = vsel %vm281_vm2, %v1096_v53, 0.0 }
  0xdd   :  { %v1108_v59 = vpop.f32.mrb[3].mxu1  ;;  %v339_v1 = vsel %vm281_vm2, %v1102_v56, 0.0  ;;  %v285_v9 = vsel %vm281_vm2, %v1106_v58, 0.0 }
  0xde   :  { %v333_v8 = vsel %vm281_vm2, %v1108_v59, 0.0 }
  0xdf   :  { %292 = vadd.xlane.f32.xlu1 %v291_v61 }
  0xe0   :  { %283 = vadd.xlane.f32.xlu0 %v282_v60 }
  0xe1   :  { %v1114_v62 = vpop.f32.mrb[4].mxu0 }
  0xe2   :  { %v1116_v63 = vpop.f32.mrb[4].mxu1  ;;  %v1122_v2 = vpop.f32.mrb[5].mxu0  ;;  %v300_v10 = vsel %vm281_vm2, %v1114_v62, 0.0 }
  0xe3   :  { %v1124_v3 = vpop.f32.mrb[5].mxu1  ;;  %340 = vadd.xlane.f32.xlu1 %v339_v1  ;;  %v1126_v4 = vpop.f32.mrb[6].mxu0  ;;  %v348_v18 = vsel %vm281_vm2, %v1116_v63, 0.0  ;;  %v294_v24 = vsel %vm281_vm2, %v1122_v2, 0.0 }
  0xe4   :  { %331 = vadd.xlane.f32.xlu0 %v330_v0  ;;  %v1128_v5 = vpop.f32.mrb[6].mxu1  ;;  %v1130_v6 = vpop.f32.mrb[7].mxu0  ;;  %v303_v11 = vsel %vm281_vm2, %v1126_v4, 0.0  ;;  %v342_v32 = vsel %vm281_vm2, %v1124_v3, 0.0 }
  0xe5   :  { %v1132_v7 = vpop.f32.mrb[7].mxu1  ;;  %v351_v19 = vsel %vm281_vm2, %v1128_v5, 0.0  ;;  %v297_v25 = vsel %vm281_vm2, %v1130_v6, 0.0 }
  0xe6   :  { %v345_v33 = vsel %vm281_vm2, %v1132_v7, 0.0 }
  0xe7   :  { %334 = vadd.xlane.f32.xlu1 %v333_v8 }
  0xe8   :  { %286 = vadd.xlane.f32.xlu0 %v285_v9 }
  0xe9   :  { %v1142_v12 = vpop.f32.mrb[8].mxu0 }
  0xea   :  { %v1144_v13 = vpop.f32.mrb[8].mxu1  ;;  %v1146_v14 = vpop.f32.mrb[9].mxu0  ;;  %v312_v34 = vsel %vm281_vm2, %v1142_v12, 0.0 }
  0xeb   :  { %v1148_v15 = vpop.f32.mrb[9].mxu1  ;;  %304 = vadd.xlane.f32.xlu1 %v303_v11  ;;  %v1150_v16 = vpop.f32.mrb[10].mxu0  ;;  %v360_v36 = vsel %vm281_vm2, %v1144_v13, 0.0  ;;  %v306_v38 = vsel %vm281_vm2, %v1146_v14, 0.0 }
  0xec   :  { %301 = vadd.xlane.f32.xlu0 %v300_v10  ;;  %v1152_v17 = vpop.f32.mrb[10].mxu1  ;;  %v1158_v20 = vpop.f32.mrb[11].mxu0  ;;  %v315_v35 = vsel %vm281_vm2, %v1150_v16, 0.0  ;;  %v354_v40 = vsel %vm281_vm2, %v1148_v15, 0.0 }
  0xed   :  { %v1160_v21 = vpop.f32.mrb[11].mxu1  ;;  %v363_v37 = vsel %vm281_vm2, %v1152_v17, 0.0  ;;  %v309_v39 = vsel %vm281_vm2, %v1158_v20, 0.0 }
  0xee   :  { %v357_v41 = vsel %vm281_vm2, %v1160_v21, 0.0 }
  0xef   :  { %352 = vadd.xlane.f32.xlu1 %v351_v19 }
  0xf0   :  { %349 = vadd.xlane.f32.xlu0 %v348_v18 }
  0xf1   :  { %v1162_v22 = vpop.f32.mrb[12].mxu0 }
  0xf2   :  { %v1164_v23 = vpop.f32.mrb[12].mxu1  ;;  %v1170_v26 = vpop.f32.mrb[13].mxu0  ;;  %v324_v42 = vsel %vm281_vm2, %v1162_v22, 0.0 }
  0xf3   :  { %v1172_v27 = vpop.f32.mrb[13].mxu1  ;;  %298 = vadd.xlane.f32.xlu1 %v297_v25  ;;  %v1174_v28 = vpop.f32.mrb[14].mxu0  ;;  %v318_v44 = vsel %vm281_vm2, %v1170_v26, 0.0  ;;  %v372_v48 = vsel %vm281_vm2, %v1164_v23, 0.0 }
  0xf4   :  { %295 = vadd.xlane.f32.xlu0 %v294_v24  ;;  %v1176_v29 = vpop.f32.mrb[14].mxu1  ;;  %v1178_v30 = vpop.f32.mrb[15].mxu0  ;;  %v327_v43 = vsel %vm281_vm2, %v1174_v28, 0.0  ;;  %v366_v46 = vsel %vm281_vm2, %v1172_v27, 0.0 }
  0xf5   :  { %v1180_v31 = vpop.f32.mrb[15].mxu1  ;;  %v321_v45 = vsel %vm281_vm2, %v1178_v30, 0.0  ;;  %v375_v49 = vsel %vm281_vm2, %v1176_v29, 0.0 }
  0xf6   :  { %v369_v47 = vsel %vm281_vm2, %v1180_v31, 0.0 }
  0xf7   :  { %346 = vadd.xlane.f32.xlu1 %v345_v33 }
  0xf8   :  { %343 = vadd.xlane.f32.xlu0 %v342_v32 }
  0xfb   :  { %316 = vadd.xlane.f32.xlu1 %v315_v35 }
  0xfc   :  { %313 = vadd.xlane.f32.xlu0 %v312_v34 }
  0xff   :  { %364 = vadd.xlane.f32.xlu1 %v363_v37 }
 0x100   :  { %361 = vadd.xlane.f32.xlu0 %v360_v36 }
 0x103   :  { %310 = vadd.xlane.f32.xlu1 %v309_v39 }
 0x104   :  { %307 = vadd.xlane.f32.xlu0 %v306_v38 }
 0x107   :  { %358 = vadd.xlane.f32.xlu1 %v357_v41 }
 0x108   :  { %355 = vadd.xlane.f32.xlu0 %v354_v40 }
 0x10b   :  { %328 = vadd.xlane.f32.xlu1 %v327_v43 }
 0x10c   :  { %325 = vadd.xlane.f32.xlu0 %v324_v42 }
 0x10f   :  { %322 = vadd.xlane.f32.xlu1 %v321_v45 }
 0x110   :  { %319 = vadd.xlane.f32.xlu0 %v318_v44 }
 0x113   :  { %370 = vadd.xlane.f32.xlu1 %v369_v47 }
 0x114   :  { %367 = vadd.xlane.f32.xlu0 %v366_v46 }
 0x117   :  { %376 = vadd.xlane.f32.xlu1 %v375_v49 }
 0x118   :  { %373 = vadd.xlane.f32.xlu0 %v372_v48 }
 0x168   :  { %v290_v55 = vpop.xlane.xlu1 %289 }
 0x169   :  { %v338_v54 = vpop.xlane.xlu0 %337  ;;  %v381_v61 = vmul.f32 0.010416667, %v290_v55 }
 0x16a   :  { %v397_v60 = vmul.f32 0.010416667, %v338_v54 }
 0x16b   :  { %v1222_v1 = vsub.f32 %v1090_v50, %v381_v61 }
 0x16c   :  { %v1219_v0 = vsub.f32 %v1092_v51, %v397_v60  ;;  %v293_v9 = vpop.xlane.xlu1 %292 }
 0x16d   :  { %v284_v8 = vpop.xlane.xlu0 %283  ;;  %v382_v11 = vmul.f32 0.010416667, %v293_v9  ;;  %v445_v18 = vmul.f32 %v1222_v1, %v1222_v1 }
 0x16e   :  { %v379_v10 = vmul.f32 0.010416667, %v284_v8  ;;  %v461_v51 = vmul.f32 %v1219_v0, %v1219_v0 }
 0x16f   :  { %v1230_v24 = vsub.f32 %v1104_v57, %v382_v11  ;;  %v481_v25 = vsel %vm281_vm2, %v445_v18, 0.0 }
 0x170   :  { %v1227_v19 = vsub.f32 %v1094_v52, %v379_v10  ;;  %v341_v32 = vpop.xlane.xlu1 %340  ;;  %482 = vadd.xlane.f32.xlu0 %v481_v25  ;;  %v529_v37 = vsel %vm281_vm2, %v461_v51, 0.0 }
 0x171   :  { %v332_v50 = vpop.xlane.xlu0 %331  ;;  %v398_v34 = vmul.f32 0.010416667, %v341_v32  ;;  %v446_v35 = vmul.f32 %v1230_v24, %v1230_v24 }
 0x172   :  { %v395_v33 = vmul.f32 0.010416667, %v332_v50  ;;  %v443_v52 = vmul.f32 %v1227_v19, %v1227_v19 }
 0x173   :  { %v1243_v57 = vsub.f32 %v1102_v56, %v398_v34  ;;  %v484_v38 = vsel %vm281_vm2, %v446_v35, 0.0 }
 0x174   :  { %v1240_v36 = vsub.f32 %v1096_v53, %v395_v33  ;;  %v335_v39 = vpop.xlane.xlu1 %334  ;;  %530 = vadd.xlane.f32.xlu0 %v529_v37  ;;  %485 = vadd.xlane.f32.xlu1 %v484_v38  ;;  %v475_v44 = vsel %vm281_vm2, %v443_v52, 0.0 }
 0x175   :  { %v287_v40 = vpop.xlane.xlu0 %286  ;;  %v396_v41 = vmul.f32 0.010416667, %v335_v39  ;;  %v462_v43 = vmul.f32 %v1243_v57, %v1243_v57 }
 0x176   :  { %v380_v42 = vmul.f32 0.010416667, %v287_v40  ;;  %v459_v46 = vmul.f32 %v1240_v36, %v1240_v36 }
 0x177   :  { %v1251_v53 = vsub.f32 %v1108_v59, %v396_v41  ;;  %v532_v45 = vsel %vm281_vm2, %v462_v43, 0.0 }
 0x178   :  { %v1254_v56 = vsub.f32 %v1106_v58, %v380_v42  ;;  %v305_v48 = vpop.xlane.xlu1 %304  ;;  %476 = vadd.xlane.f32.xlu0 %v475_v44  ;;  %533 = vadd.xlane.f32.xlu1 %v532_v45  ;;  %v523_v61 = vsel %vm281_vm2, %v459_v46, 0.0 }
 0x179   :  { %v302_v47 = vpop.xlane.xlu0 %301  ;;  %v386_v54 = vmul.f32 0.010416667, %v305_v48  ;;  %v460_v59 = vmul.f32 %v1251_v53, %v1251_v53 }
 0x17a   :  { %v385_v49 = vmul.f32 0.010416667, %v302_v47  ;;  %v444_v55 = vmul.f32 %v1254_v56, %v1254_v56 }
 0x17b   :  { %v1267_v60 = vsub.f32 %v1126_v4, %v386_v54  ;;  %v526_v51 = vsel %vm281_vm2, %v460_v59, 0.0 }
 0x17c   :  { %v1264_v58 = vsub.f32 %v1114_v62, %v385_v49  ;;  %v478_v8 = vsel %vm281_vm2, %v444_v55, 0.0  ;;  %v353_v10 = vpop.xlane.xlu1 %352  ;;  %524 = vadd.xlane.f32.xlu0 %v523_v61 }
 0x17d   :  { %v350_v9 = vpop.xlane.xlu0 %349  ;;  %479 = vadd.xlane.f32.xlu1 %v478_v8  ;;  %v402_v18 = vmul.f32 0.010416667, %v353_v10  ;;  %v450_v32 = vmul.f32 %v1267_v60, %v1267_v60 }
 0x17e   :  { %v401_v11 = vmul.f32 0.010416667, %v350_v9  ;;  %v449_v25 = vmul.f32 %v1264_v58, %v1264_v58 }
 0x17f   :  { %v1278_v4 = vsub.f32 %v1128_v5, %v402_v18  ;;  %v496_v40 = vsel %vm281_vm2, %v450_v32, 0.0 }
 0x180   :  { %v1275_v62 = vsub.f32 %v1116_v63, %v401_v11  ;;  %v493_v50 = vsel %vm281_vm2, %v449_v25, 0.0  ;;  %v299_v34 = vpop.xlane.xlu1 %298 }
 0x181   :  { %v296_v33 = vpop.xlane.xlu0 %295  ;;  %494 = vadd.xlane.f32.xlu0 %v493_v50  ;;  %527 = vadd.xlane.f32.xlu1 %v526_v51  ;;  %v384_v52 = vmul.f32 0.010416667, %v299_v34  ;;  %v466_v63 = vmul.f32 %v1278_v4, %v1278_v4 }
 0x182   :  { %v383_v35 = vmul.f32 0.010416667, %v296_v33  ;;  %v465_v37 = vmul.f32 %v1275_v62, %v1275_v62 }
 0x183   :  { %v1291_v38 = vsub.f32 %v1130_v6, %v384_v52  ;;  %v544_v46 = vsel %vm281_vm2, %v466_v63, 0.0 }
 0x184   :  { %v1288_v5 = vsub.f32 %v1122_v2, %v383_v35  ;;  %v541_v39 = vsel %vm281_vm2, %v465_v37, 0.0  ;;  %v347_v42 = vpop.xlane.xlu1 %346 }
 0x185   :  { %v344_v41 = vpop.xlane.xlu0 %343  ;;  %542 = vadd.xlane.f32.xlu0 %v541_v39  ;;  %497 = vadd.xlane.f32.xlu1 %v496_v40  ;;  %v400_v44 = vmul.f32 0.010416667, %v347_v42  ;;  %v448_v48 = vmul.f32 %v1291_v38, %v1291_v38 }
 0x186   :  { %v399_v43 = vmul.f32 0.010416667, %v344_v41  ;;  %v447_v45 = vmul.f32 %v1288_v5, %v1288_v5 }
 0x187   :  { %v1302_v6 = vsub.f32 %v1132_v7, %v400_v44  ;;  %v490_v10 = vsel %vm281_vm2, %v448_v48, 0.0 }
 0x188   :  { %v1299_v2 = vsub.f32 %v1124_v3, %v399_v43  ;;  %v487_v47 = vsel %vm281_vm2, %v447_v45, 0.0  ;;  %v317_v54 = vpop.xlane.xlu1 %316 }
 0x189   :  { %v314_v49 = vpop.xlane.xlu0 %313  ;;  %488 = vadd.xlane.f32.xlu0 %v487_v47  ;;  %545 = vadd.xlane.f32.xlu1 %v544_v46  ;;  %v390_v59 = vmul.f32 0.010416667, %v317_v54  ;;  %v464_v3 = vmul.f32 %v1302_v6, %v1302_v6 }
 0x18a   :  { %v389_v55 = vmul.f32 0.010416667, %v314_v49  ;;  %v463_v61 = vmul.f32 %v1299_v2, %v1299_v2 }
 0x18b   :  { %v1315_v8 = vsub.f32 %v1150_v16, %v390_v59  ;;  %v538_v32 = vsel %vm281_vm2, %v464_v3, 0.0 }
 0x18c   :  { %v1312_v7 = vsub.f32 %v1142_v12, %v389_v55  ;;  %v535_v9 = vsel %vm281_vm2, %v463_v61, 0.0  ;;  %v365_v18 = vpop.xlane.xlu1 %364 }
 0x18d   :  { %v362_v11 = vpop.xlane.xlu0 %361  ;;  %536 = vadd.xlane.f32.xlu0 %v535_v9  ;;  %491 = vadd.xlane.f32.xlu1 %v490_v10  ;;  %v406_v51 = vmul.f32 0.010416667, %v365_v18  ;;  %v454_v34 = vmul.f32 %v1315_v8, %v1315_v8 }
 0x18e   :  { %v405_v25 = vmul.f32 0.010416667, %v362_v11  ;;  %v453_v50 = vmul.f32 %v1312_v7, %v1312_v7 }
 0x18f   :  { %v1326_v16 = vsub.f32 %v1152_v17, %v406_v51  ;;  %v508_v42 = vsel %vm281_vm2, %v454_v34, 0.0 }
 0x190   :  { %v1323_v12 = vsub.f32 %v1144_v13, %v405_v25  ;;  %v505_v33 = vsel %vm281_vm2, %v453_v50, 0.0  ;;  %v311_v52 = vpop.xlane.xlu1 %310 }
 0x191   :  { %v308_v35 = vpop.xlane.xlu0 %307  ;;  %506 = vadd.xlane.f32.xlu0 %v505_v33  ;;  %539 = vadd.xlane.f32.xlu1 %v538_v32  ;;  %v388_v63 = vmul.f32 0.010416667, %v311_v52  ;;  %v470_v13 = vmul.f32 %v1326_v16, %v1326_v16 }
 0x192   :  { %v387_v37 = vmul.f32 0.010416667, %v308_v35  ;;  %v469_v39 = vmul.f32 %v1323_v12, %v1323_v12 }
 0x193   :  { %v1339_v40 = vsub.f32 %v1158_v20, %v388_v63  ;;  %v556_v48 = vsel %vm281_vm2, %v470_v13, 0.0 }
 0x194   :  { %v1336_v17 = vsub.f32 %v1146_v14, %v387_v37  ;;  %v553_v41 = vsel %vm281_vm2, %v469_v39, 0.0  ;;  %v359_v44 = vpop.xlane.xlu1 %358 }
 0x195   :  { %v356_v43 = vpop.xlane.xlu0 %355  ;;  %554 = vadd.xlane.f32.xlu0 %v553_v41  ;;  %509 = vadd.xlane.f32.xlu1 %v508_v42  ;;  %v404_v46 = vmul.f32 0.010416667, %v359_v44  ;;  %v452_v54 = vmul.f32 %v1339_v40, %v1339_v40 }
 0x196   :  { %v403_v45 = vmul.f32 0.010416667, %v356_v43  ;;  %v451_v47 = vmul.f32 %v1336_v17, %v1336_v17 }
 0x197   :  { %v1350_v20 = vsub.f32 %v1160_v21, %v404_v46  ;;  %v502_v18 = vsel %vm281_vm2, %v452_v54, 0.0 }
 0x198   :  { %v1347_v14 = vsub.f32 %v1148_v15, %v403_v45  ;;  %v499_v49 = vsel %vm281_vm2, %v451_v47, 0.0  ;;  %v329_v59 = vpop.xlane.xlu1 %328 }
 0x199   :  { %v326_v55 = vpop.xlane.xlu0 %325  ;;  %500 = vadd.xlane.f32.xlu0 %v499_v49  ;;  %557 = vadd.xlane.f32.xlu1 %v556_v48  ;;  %v394_v3 = vmul.f32 0.010416667, %v329_v59  ;;  %v468_v15 = vmul.f32 %v1350_v20, %v1350_v20 }
 0x19a   :  { %v393_v61 = vmul.f32 0.010416667, %v326_v55  ;;  %v467_v9 = vmul.f32 %v1347_v14, %v1347_v14 }
 0x19b   :  { %v1363_v10 = vsub.f32 %v1174_v28, %v394_v3  ;;  %v550_v34 = vsel %vm281_vm2, %v468_v15, 0.0 }
 0x19c   :  { %v1360_v21 = vsub.f32 %v1162_v22, %v393_v61  ;;  %v547_v11 = vsel %vm281_vm2, %v467_v9, 0.0  ;;  %v323_v51 = vpop.xlane.xlu1 %322 }
 0x19d   :  { %548 = vadd.xlane.f32.xlu0 %v547_v11  ;;  %v320_v25 = vpop.xlane.xlu0 %319  ;;  %503 = vadd.xlane.f32.xlu1 %v502_v18  ;;  %v392_v32 = vmul.f32 0.010416667, %v323_v51  ;;  %v458_v52 = vmul.f32 %v1363_v10, %v1363_v10 }
 0x19e   :  { %v391_v50 = vmul.f32 0.010416667, %v320_v25  ;;  %v457_v33 = vmul.f32 %v1360_v21, %v1360_v21 }
 0x19f   :  { %v1374_v28 = vsub.f32 %v1178_v30, %v392_v32  ;;  %v520_v44 = vsel %vm281_vm2, %v458_v52, 0.0 }
 0x1a0   :  { %v1371_v22 = vsub.f32 %v1170_v26, %v391_v50  ;;  %v517_v35 = vsel %vm281_vm2, %v457_v33, 0.0  ;;  %v371_v63 = vpop.xlane.xlu1 %370 }
 0x1a1   :  { %518 = vadd.xlane.f32.xlu0 %v517_v35  ;;  %v368_v37 = vpop.xlane.xlu0 %367  ;;  %551 = vadd.xlane.f32.xlu1 %v550_v34  ;;  %v408_v13 = vmul.f32 0.010416667, %v371_v63  ;;  %v456_v26 = vmul.f32 %v1374_v28, %v1374_v28 }
 0x1a2   :  { %v407_v39 = vmul.f32 0.010416667, %v368_v37  ;;  %v455_v41 = vmul.f32 %v1371_v22, %v1371_v22 }
 0x1a3   :  { %v1387_v42 = vsub.f32 %v1180_v31, %v408_v13  ;;  %v514_v54 = vsel %vm281_vm2, %v456_v26, 0.0 }
 0x1a4   :  { %v1384_v30 = vsub.f32 %v1172_v27, %v407_v39  ;;  %v511_v43 = vsel %vm281_vm2, %v455_v41, 0.0  ;;  %v377_v46 = vpop.xlane.xlu1 %376 }
 0x1a5   :  { %512 = vadd.xlane.f32.xlu0 %v511_v43  ;;  %v374_v45 = vpop.xlane.xlu0 %373  ;;  %521 = vadd.xlane.f32.xlu1 %v520_v44  ;;  %v410_v48 = vmul.f32 0.010416667, %v377_v46  ;;  %v472_v59 = vmul.f32 %v1387_v42, %v1387_v42  ;;  %v1413_v46 = vld [vmem:[%s1646_s2] ss:$0 sm:$0xff] }
 0x1a6   :  { %v409_v47 = vmul.f32 0.010416667, %v374_v45  ;;  %v471_v49 = vmul.f32 %v1384_v30, %v1384_v30 }
 0x1a7   :  { %v1398_v31 = vsub.f32 %v1176_v29, %v410_v48  ;;  %v562_v9 = vsel %vm281_vm2, %v472_v59, 0.0  ;;  %v1419_v59 = vld [vmem:[%s1647_s3] ss:$0 sm:$0xff] }
 0x1a8   :  { %v1395_v27 = vsub.f32 %v1164_v23, %v409_v47  ;;  %v559_v55 = vsel %vm281_vm2, %v471_v49, 0.0 }
 0x1a9   :  { %560 = vadd.xlane.f32.xlu0 %v559_v55  ;;  %515 = vadd.xlane.f32.xlu1 %v514_v54  ;;  %v474_v23 = vmul.f32 %v1398_v31, %v1398_v31 }
 0x1aa   :  { %v473_v61 = vmul.f32 %v1395_v27, %v1395_v27 }
 0x1ab   :  { %v568_v29 = vsel %vm281_vm2, %v474_v23, 0.0 }
 0x1ac   :  { %v565_v3 = vsel %vm281_vm2, %v473_v61, 0.0 }
 0x1ad   :  { %566 = vadd.xlane.f32.xlu0 %v565_v3  ;;  %563 = vadd.xlane.f32.xlu1 %v562_v9 }
 0x1b1   :  { %569 = vadd.xlane.f32.xlu1 %v568_v29 }
 0x1fd   :  { %v483_v15 = vpop.xlane.xlu0 %482 }
 0x1fe   :  { %v573_v11 = vmul.f32 0.010416667, %v483_v15 }
 0x200   :  { %v605_v18 = vadd.f32 1e-06, %v573_v11 }
 0x201   :  { %v531_v25 = vpop.xlane.xlu0 %530  ;;  %v486_v51 = vpop.xlane.xlu1 %485 }
 0x202   :  { %886 = vrsqrt.f32 %v605_v18  ;;  %v589_v50 = vmul.f32 0.010416667, %v531_v25  ;;  %v574_v32 = vmul.f32 0.010416667, %v486_v51 }
 0x204   :  { %v621_v33 = vadd.f32 1e-06, %v589_v50  ;;  %v606_v34 = vadd.f32 1e-06, %v574_v32 }
 0x205   :  { %v477_v35 = vpop.xlane.xlu0 %476  ;;  %v534_v52 = vpop.xlane.xlu1 %533 }
 0x206   :  { %888 = vrsqrt.f32 %v621_v33  ;;  %v571_v37 = vmul.f32 0.010416667, %v477_v35  ;;  %v590_v63 = vmul.f32 0.010416667, %v534_v52 }
 0x207   :  { %890 = vrsqrt.f32 %v606_v34 }
 0x208   :  { %v603_v39 = vadd.f32 1e-06, %v571_v37  ;;  %v622_v13 = vadd.f32 1e-06, %v590_v63 }
 0x209   :  { %v525_v41 = vpop.xlane.xlu0 %524 }
 0x20a   :  { %v480_v26 = vpop.xlane.xlu1 %479  ;;  %892 = vrsqrt.f32 %v603_v39  ;;  %v587_v43 = vmul.f32 0.010416667, %v525_v41 }
 0x20b   :  { %v572_v44 = vmul.f32 0.010416667, %v480_v26  ;;  %894 = vrsqrt.f32 %v622_v13 }
 0x20c   :  { %v887_v45 = vpop.eup %886  ;;  %v619_v47 = vadd.f32 1e-06, %v587_v43 }
 0x20d   :  { %v604_v48 = vadd.f32 1e-06, %v572_v44  ;;  %v669_v49 = vmul.f32 %v887_v45, %v1222_v1 }
 0x20e   :  { %v495_v54 = vpop.xlane.xlu0 %494  ;;  %v528_v55 = vpop.xlane.xlu1 %527  ;;  %896 = vrsqrt.f32 %v619_v47 }
 0x20f   :  { %v577_v61 = vmul.f32 0.010416667, %v495_v54  ;;  %v588_v3 = vmul.f32 0.010416667, %v528_v55  ;;  %v708_v9 = vmul.f32 %v1413_v46, %v669_v49  ;;  %898 = vrsqrt.f32 %v604_v48 }
 0x210   :  { %v889_v23 = vpop.eup %888 }
 0x211   :  { %v609_v29 = vadd.f32 1e-06, %v577_v61  ;;  %v620_v15 = vadd.f32 1e-06, %v588_v3  ;;  %v891_v11 = vpop.eup %890  ;;  %v747_v18 = vadd.f32 %v1419_v59, %v708_v9  ;;  %v685_v1 = vmul.f32 %v889_v23, %v1219_v0 }
 0x212   :  { %v543_v25 = vpop.xlane.xlu0 %542  ;;  %v498_v51 = vpop.xlane.xlu1 %497  ;;  %v670_v50 = vmul.f32 %v891_v11, %v1230_v24 }
 0x213   :  { %900 = vrsqrt.f32 %v609_v29  ;;  %v593_v32 = vmul.f32 0.010416667, %v543_v25  ;;  %v578_v33 = vmul.f32 0.010416667, %v498_v51  ;;  %779 = vst.msk [vmem:[%s1648_s4 + $0x10] sm:$0xff] %vm281_vm2, %v747_v18  ;;  %v724_v34 = vmul.f32 %v1413_v46, %v685_v1 }
 0x214   :  { %902 = vrsqrt.f32 %v620_v15  ;;  %v893_v35 = vpop.eup %892  ;;  %v709_v52 = vmul.f32 %v1413_v46, %v670_v50 }
 0x215   :  { %v625_v37 = vadd.f32 1e-06, %v593_v32  ;;  %v610_v0 = vadd.f32 1e-06, %v578_v33  ;;  %v895_v63 = vpop.eup %894  ;;  %v763_v39 = vadd.f32 %v1419_v59, %v724_v34  ;;  %v667_v24 = vmul.f32 %v893_v35, %v1227_v19 }
 0x216   :  { %v489_v13 = vpop.xlane.xlu0 %488  ;;  %v546_v41 = vpop.xlane.xlu1 %545  ;;  %v748_v26 = vadd.f32 %v1419_v59, %v709_v52  ;;  %v686_v43 = vmul.f32 %v895_v63, %v1243_v57 }
 0x217   :  { %904 = vrsqrt.f32 %v625_v37  ;;  %v575_v44 = vmul.f32 0.010416667, %v489_v13  ;;  %795 = vst.msk [vmem:[%s1648_s4 + $0x90] sm:$0xff] %vm281_vm2, %v763_v39  ;;  %v706_v45 = vmul.f32 %v1413_v46, %v667_v24  ;;  %v594_v47 = vmul.f32 0.010416667, %v546_v41 }
 0x218   :  { %906 = vrsqrt.f32 %v610_v0  ;;  %v897_v48 = vpop.eup %896  ;;  %780 = vst.msk [vmem:[%s1648_s4 + $0x18] sm:$0xff] %vm281_vm2, %v748_v26  ;;  %v725_v19 = vmul.f32 %v1413_v46, %v686_v43 }
 0x219   :  { %v607_v57 = vadd.f32 1e-06, %v575_v44  ;;  %v899_v49 = vpop.eup %898  ;;  %v745_v54 = vadd.f32 %v1419_v59, %v706_v45  ;;  %v683_v55 = vmul.f32 %v897_v48, %v1240_v36  ;;  %v626_v61 = vadd.f32 1e-06, %v594_v47 }
 0x21a   :  { %v537_v3 = vpop.xlane.xlu0 %536  ;;  %v492_v9 = vpop.xlane.xlu1 %491  ;;  %v764_v23 = vadd.f32 %v1419_v59, %v725_v19  ;;  %v668_v29 = vmul.f32 %v899_v49, %v1254_v56 }
 0x21b   :  { %908 = vrsqrt.f32 %v607_v57  ;;  %v591_v15 = vmul.f32 0.010416667, %v537_v3  ;;  %777 = vst.msk [vmem:[%s1648_s4] sm:$0xff] %vm281_vm2, %v745_v54  ;;  %v722_v11 = vmul.f32 %v1413_v46, %v683_v55  ;;  %v576_v18 = vmul.f32 0.010416667, %v492_v9 }
 0x21c   :  { %910 = vrsqrt.f32 %v626_v61  ;;  %796 = vst.msk [vmem:[%s1648_s4 + $0x98] sm:$0xff] %vm281_vm2, %v764_v23  ;;  %v707_v36 = vmul.f32 %v1413_v46, %v668_v29 }
 0x21d   :  { %v901_v1 = vpop.eup %900  ;;  %v623_v56 = vadd.f32 1e-06, %v591_v15  ;;  %v761_v51 = vadd.f32 %v1419_v59, %v722_v11  ;;  %v608_v32 = vadd.f32 1e-06, %v576_v18 }
 0x21e   :  { %v903_v25 = vpop.eup %902  ;;  %v673_v50 = vmul.f32 %v901_v1, %v1264_v58  ;;  %v507_v33 = vpop.xlane.xlu0 %506  ;;  %v746_v35 = vadd.f32 %v1419_v59, %v707_v36 }
 0x21f   :  { %v540_v34 = vpop.xlane.xlu1 %539  ;;  %v684_v52 = vmul.f32 %v903_v25, %v1251_v53  ;;  %912 = vrsqrt.f32 %v623_v56  ;;  %v581_v37 = vmul.f32 0.010416667, %v507_v33  ;;  %793 = vst.msk [vmem:[%s1648_s4 + $0x80] sm:$0xff] %vm281_vm2, %v761_v51 }
 0x220   :  { %v712_v0 = vmul.f32 %v1413_v46, %v673_v50  ;;  %914 = vrsqrt.f32 %v608_v32  ;;  %v592_v63 = vmul.f32 0.010416667, %v540_v34  ;;  %778 = vst.msk [vmem:[%s1648_s4 + $0x8] sm:$0xff] %vm281_vm2, %v746_v35 }
 0x221   :  { %v905_v39 = vpop.eup %904  ;;  %v723_v58 = vmul.f32 %v1413_v46, %v684_v52  ;;  %v613_v53 = vadd.f32 1e-06, %v581_v37 }
 0x222   :  { %v907_v24 = vpop.eup %906  ;;  %v751_v13 = vadd.f32 %v1419_v59, %v712_v0  ;;  %v689_v41 = vmul.f32 %v905_v39, %v1275_v62  ;;  %v624_v26 = vadd.f32 1e-06, %v592_v63  ;;  %v555_v43 = vpop.xlane.xlu0 %554 }
 0x223   :  { %v510_v44 = vpop.xlane.xlu1 %509  ;;  %v762_v45 = vadd.f32 %v1419_v59, %v723_v58  ;;  %v674_v47 = vmul.f32 %v907_v24, %v1267_v60  ;;  %916 = vrsqrt.f32 %v613_v53  ;;  %v597_v48 = vmul.f32 0.010416667, %v555_v43 }
 0x224   :  { %783 = vst.msk [vmem:[%s1648_s4 + $0x30] sm:$0xff] %vm281_vm2, %v751_v13  ;;  %v728_v19 = vmul.f32 %v1413_v46, %v689_v41  ;;  %918 = vrsqrt.f32 %v624_v26  ;;  %v582_v57 = vmul.f32 0.010416667, %v510_v44 }
 0x225   :  { %v909_v49 = vpop.eup %908  ;;  %794 = vst.msk [vmem:[%s1648_s4 + $0x88] sm:$0xff] %vm281_vm2, %v762_v45  ;;  %v713_v62 = vmul.f32 %v1413_v46, %v674_v47  ;;  %v629_v60 = vadd.f32 1e-06, %v597_v48 }
 0x226   :  { %v911_v54 = vpop.eup %910  ;;  %v767_v55 = vadd.f32 %v1419_v59, %v728_v19  ;;  %v671_v61 = vmul.f32 %v909_v49, %v1288_v5  ;;  %v614_v3 = vadd.f32 1e-06, %v582_v57  ;;  %v501_v9 = vpop.xlane.xlu0 %500 }
 0x227   :  { %v558_v23 = vpop.xlane.xlu1 %557  ;;  %v752_v29 = vadd.f32 %v1419_v59, %v713_v62  ;;  %v690_v15 = vmul.f32 %v911_v54, %v1278_v4  ;;  %920 = vrsqrt.f32 %v629_v60  ;;  %v579_v11 = vmul.f32 0.010416667, %v501_v9 }
 0x228   :  { %799 = vst.msk [vmem:[%s1648_s4 + $0xb0] sm:$0xff] %vm281_vm2, %v767_v55  ;;  %v710_v18 = vmul.f32 %v1413_v46, %v671_v61  ;;  %922 = vrsqrt.f32 %v614_v3  ;;  %v598_v1 = vmul.f32 0.010416667, %v558_v23 }
 0x229   :  { %v913_v36 = vpop.eup %912  ;;  %784 = vst.msk [vmem:[%s1648_s4 + $0x38] sm:$0xff] %vm281_vm2, %v752_v29  ;;  %v729_v5 = vmul.f32 %v1413_v46, %v690_v15  ;;  %v611_v4 = vadd.f32 1e-06, %v579_v11 }
 0x22a   :  { %v915_v56 = vpop.eup %914  ;;  %v749_v25 = vadd.f32 %v1419_v59, %v710_v18  ;;  %v687_v51 = vmul.f32 %v913_v36, %v1299_v2  ;;  %v630_v50 = vadd.f32 1e-06, %v598_v1  ;;  %v549_v32 = vpop.xlane.xlu0 %548 }
 0x22b   :  { %v504_v33 = vpop.xlane.xlu1 %503  ;;  %v768_v34 = vadd.f32 %v1419_v59, %v729_v5  ;;  %v672_v35 = vmul.f32 %v915_v56, %v1291_v38  ;;  %924 = vrsqrt.f32 %v611_v4  ;;  %v595_v52 = vmul.f32 0.010416667, %v549_v32 }
 0x22c   :  { %781 = vst.msk [vmem:[%s1648_s4 + $0x20] sm:$0xff] %vm281_vm2, %v749_v25  ;;  %v726_v37 = vmul.f32 %v1413_v46, %v687_v51  ;;  %926 = vrsqrt.f32 %v630_v50  ;;  %v580_v0 = vmul.f32 0.010416667, %v504_v33 }
 0x22d   :  { %v917_v63 = vpop.eup %916  ;;  %800 = vst.msk [vmem:[%s1648_s4 + $0xb8] sm:$0xff] %vm281_vm2, %v768_v34  ;;  %v711_v2 = vmul.f32 %v1413_v46, %v672_v35  ;;  %v627_v38 = vadd.f32 1e-06, %v595_v52 }
 0x22e   :  { %v919_v39 = vpop.eup %918  ;;  %v765_v58 = vadd.f32 %v1419_v59, %v726_v37  ;;  %v677_v53 = vmul.f32 %v917_v63, %v1312_v7  ;;  %v612_v24 = vadd.f32 1e-06, %v580_v0  ;;  %v519_v13 = vpop.xlane.xlu0 %518 }
 0x22f   :  { %v552_v41 = vpop.xlane.xlu1 %551  ;;  %v750_v26 = vadd.f32 %v1419_v59, %v711_v2  ;;  %v688_v43 = vmul.f32 %v919_v39, %v1302_v6  ;;  %928 = vrsqrt.f32 %v627_v38  ;;  %v585_v44 = vmul.f32 0.010416667, %v519_v13 }
 0x230   :  { %797 = vst.msk [vmem:[%s1648_s4 + $0xa0] sm:$0xff] %vm281_vm2, %v765_v58  ;;  %v716_v45 = vmul.f32 %v1413_v46, %v677_v53  ;;  %930 = vrsqrt.f32 %v612_v24  ;;  %v596_v47 = vmul.f32 0.010416667, %v552_v41 }
 0x231   :  { %v921_v48 = vpop.eup %920  ;;  %782 = vst.msk [vmem:[%s1648_s4 + $0x28] sm:$0xff] %vm281_vm2, %v750_v26  ;;  %v727_v7 = vmul.f32 %v1413_v46, %v688_v43  ;;  %v617_v6 = vadd.f32 1e-06, %v585_v44 }
 0x232   :  { %v923_v19 = vpop.eup %922  ;;  %v755_v57 = vadd.f32 %v1419_v59, %v716_v45  ;;  %v693_v49 = vmul.f32 %v921_v48, %v1323_v12  ;;  %v628_v62 = vadd.f32 1e-06, %v596_v47  ;;  %v513_v60 = vpop.xlane.xlu0 %512 }
 0x233   :  { %v522_v54 = vpop.xlane.xlu1 %521  ;;  %v766_v55 = vadd.f32 %v1419_v59, %v727_v7  ;;  %v678_v61 = vmul.f32 %v923_v19, %v1315_v8  ;;  %932 = vrsqrt.f32 %v617_v6  ;;  %v583_v3 = vmul.f32 0.010416667, %v513_v60 }
 0x234   :  { %787 = vst.msk [vmem:[%s1648_s4 + $0x50] sm:$0xff] %vm281_vm2, %v755_v57  ;;  %v732_v9 = vmul.f32 %v1413_v46, %v693_v49  ;;  %934 = vrsqrt.f32 %v628_v62  ;;  %v586_v23 = vmul.f32 0.010416667, %v522_v54 }
 0x235   :  { %v925_v29 = vpop.eup %924  ;;  %798 = vst.msk [vmem:[%s1648_s4 + $0xa8] sm:$0xff] %vm281_vm2, %v766_v55  ;;  %v717_v12 = vmul.f32 %v1413_v46, %v678_v61  ;;  %v615_v8 = vadd.f32 1e-06, %v583_v3 }
 0x236   :  { %v927_v15 = vpop.eup %926  ;;  %v771_v11 = vadd.f32 %v1419_v59, %v732_v9  ;;  %v675_v18 = vmul.f32 %v925_v29, %v1336_v17  ;;  %v618_v1 = vadd.f32 1e-06, %v586_v23  ;;  %v561_v36 = vpop.xlane.xlu0 %560 }
 0x237   :  { %v516_v5 = vpop.xlane.xlu1 %515  ;;  %v756_v4 = vadd.f32 %v1419_v59, %v717_v12  ;;  %v694_v56 = vmul.f32 %v927_v15, %v1326_v16  ;;  %936 = vrsqrt.f32 %v615_v8  ;;  %v599_v25 = vmul.f32 0.010416667, %v561_v36 }
 0x238   :  { %803 = vst.msk [vmem:[%s1648_s4 + $0xd0] sm:$0xff] %vm281_vm2, %v771_v11  ;;  %v714_v51 = vmul.f32 %v1413_v46, %v675_v18  ;;  %938 = vrsqrt.f32 %v618_v1  ;;  %v584_v50 = vmul.f32 0.010416667, %v516_v5 }
 0x239   :  { %v929_v32 = vpop.eup %928  ;;  %788 = vst.msk [vmem:[%s1648_s4 + $0x58] sm:$0xff] %vm281_vm2, %v756_v4  ;;  %v733_v17 = vmul.f32 %v1413_v46, %v694_v56  ;;  %v631_v16 = vadd.f32 1e-06, %v599_v25 }
 0x23a   :  { %v931_v33 = vpop.eup %930  ;;  %v753_v34 = vadd.f32 %v1419_v59, %v714_v51  ;;  %v691_v35 = vmul.f32 %v929_v32, %v1347_v14  ;;  %v616_v52 = vadd.f32 1e-06, %v584_v50  ;;  %v567_v37 = vpop.xlane.xlu0 %566 }
 0x23b   :  { %v564_v0 = vpop.xlane.xlu1 %563  ;;  %v772_v63 = vadd.f32 %v1419_v59, %v733_v17  ;;  %v676_v2 = vmul.f32 %v931_v33, %v1339_v40  ;;  %940 = vrsqrt.f32 %v631_v16  ;;  %v601_v38 = vmul.f32 0.010416667, %v567_v37 }
 0x23c   :  { %785 = vst.msk [vmem:[%s1648_s4 + $0x40] sm:$0xff] %vm281_vm2, %v753_v34  ;;  %v730_v39 = vmul.f32 %v1413_v46, %v691_v35  ;;  %942 = vrsqrt.f32 %v616_v52  ;;  %v600_v58 = vmul.f32 0.010416667, %v564_v0 }
 0x23d   :  { %v933_v53 = vpop.eup %932  ;;  %804 = vst.msk [vmem:[%s1648_s4 + $0xd8] sm:$0xff] %vm281_vm2, %v772_v63  ;;  %v715_v14 = vmul.f32 %v1413_v46, %v676_v2  ;;  %v633_v40 = vadd.f32 1e-06, %v601_v38 }
 0x23e   :  { %v935_v24 = vpop.eup %934  ;;  %v769_v13 = vadd.f32 %v1419_v59, %v730_v39  ;;  %v681_v41 = vmul.f32 %v933_v53, %v1360_v21  ;;  %v632_v26 = vadd.f32 1e-06, %v600_v58 }
 0x23f   :  { %v570_v43 = vpop.xlane.xlu1 %569  ;;  %v754_v44 = vadd.f32 %v1419_v59, %v715_v14  ;;  %v692_v45 = vmul.f32 %v935_v24, %v1350_v20  ;;  %944 = vrsqrt.f32 %v633_v40 }
 0x240   :  { %v602_v47 = vmul.f32 0.010416667, %v570_v43  ;;  %801 = vst.msk [vmem:[%s1648_s4 + $0xc0] sm:$0xff] %vm281_vm2, %v769_v13  ;;  %v720_v48 = vmul.f32 %v1413_v46, %v681_v41  ;;  %946 = vrsqrt.f32 %v632_v26 }
 0x241   :  { %v937_v7 = vpop.eup %936  ;;  %786 = vst.msk [vmem:[%s1648_s4 + $0x48] sm:$0xff] %vm281_vm2, %v754_v44  ;;  %v731_v21 = vmul.f32 %v1413_v46, %v692_v45 }
 0x242   :  { %v634_v6 = vadd.f32 1e-06, %v602_v47  ;;  %v939_v20 = vpop.eup %938  ;;  %v759_v19 = vadd.f32 %v1419_v59, %v720_v48  ;;  %v679_v57 = vmul.f32 %v937_v7, %v1371_v22 }
 0x243   :  { %v770_v49 = vadd.f32 %v1419_v59, %v731_v21  ;;  %v682_v62 = vmul.f32 %v939_v20, %v1363_v10 }
 0x244   :  { %948 = vrsqrt.f32 %v634_v6  ;;  %791 = vst.msk [vmem:[%s1648_s4 + $0x70] sm:$0xff] %vm281_vm2, %v759_v19  ;;  %v718_v60 = vmul.f32 %v1413_v46, %v679_v57 }
 0x245   :  { %v941_v54 = vpop.eup %940  ;;  %802 = vst.msk [vmem:[%s1648_s4 + $0xc8] sm:$0xff] %vm281_vm2, %v770_v49  ;;  %v721_v22 = vmul.f32 %v1413_v46, %v682_v62 }
 0x246   :  { %v943_v55 = vpop.eup %942  ;;  %v757_v61 = vadd.f32 %v1419_v59, %v718_v60  ;;  %v695_v10 = vmul.f32 %v941_v54, %v1384_v30 }
 0x247   :  { %v760_v3 = vadd.f32 %v1419_v59, %v721_v22  ;;  %v680_v9 = vmul.f32 %v943_v55, %v1374_v28 }
 0x248   :  { %789 = vst.msk [vmem:[%s1648_s4 + $0x60] sm:$0xff] %vm281_vm2, %v757_v61  ;;  %v734_v23 = vmul.f32 %v1413_v46, %v695_v10 }
 0x249   :  { %v945_v29 = vpop.eup %944  ;;  %792 = vst.msk [vmem:[%s1648_s4 + $0x78] sm:$0xff] %vm281_vm2, %v760_v3  ;;  %v719_v12 = vmul.f32 %v1413_v46, %v680_v9 }
 0x24a   :  { %v947_v30 = vpop.eup %946  ;;  %v773_v8 = vadd.f32 %v1419_v59, %v734_v23  ;;  %v697_v28 = vmul.f32 %v945_v29, %v1395_v27 }
 0x24b   :  { %v758_v15 = vadd.f32 %v1419_v59, %v719_v12  ;;  %v696_v11 = vmul.f32 %v947_v30, %v1387_v42 }
 0x24c   :  { %805 = vst.msk [vmem:[%s1648_s4 + $0xe0] sm:$0xff] %vm281_vm2, %v773_v8  ;;  %v736_v18 = vmul.f32 %v1413_v46, %v697_v28 }
 0x24d   :  { %790 = vst.msk [vmem:[%s1648_s4 + $0x68] sm:$0xff] %vm281_vm2, %v758_v15  ;;  %v735_v36 = vmul.f32 %v1413_v46, %v696_v11 }
 0x24e   :  { %v949_v1 = vpop.eup %948  ;;  %v775_v27 = vadd.f32 %v1419_v59, %v736_v18 }
 0x24f   :  { %v698_v5 = vmul.f32 %v949_v1, %v1398_v31  ;;  %v774_v42 = vadd.f32 %v1419_v59, %v735_v36 }
 0x250   :  { %807 = vst.msk [vmem:[%s1648_s4 + $0xf0] sm:$0xff] %vm281_vm2, %v775_v27 }
 0x251   :  { %v737_v4 = vmul.f32 %v1413_v46, %v698_v5  ;;  %806 = vst.msk [vmem:[%s1648_s4 + $0xe8] sm:$0xff] %vm281_vm2, %v774_v42 }
 0x253   :  { %v776_v56 = vadd.f32 %v1419_v59, %v737_v4 }
 0x255   :  { %808 = vst.msk [vmem:[%s1648_s4 + $0xf8] sm:$0xff] %vm281_vm2, %v776_v56 }

</bundles_post_ra>
